<compile_context>
chip_gen: v7x
topology: tpu7x:2x2x1
jax: 0.10.0
libtpu: 0.0.40
codegen_flags: <defaults>
</compile_context>

<pallas_src>
import jax
import jax.numpy as jnp
import numpy as np
from jax import lax
from jax.experimental import pallas as pl
from jax.experimental.pallas import tpu as pltpu

B, S = 2, 8          # batch, sequence
BS = B * S
VOCAB = 256          # original (unpruned) vocabulary size
EMB = 64             # pruned embedding rows (== self.embedding_size)
D = 128              # embedding dim of the wrapped model (lane-dense)


def remap_kernel(ids_ref, lut_ref, mapped_ref):
    """Stage 1: mapped[i] = clip(lut[ids[i]], 0, EMB-1).  All refs in SMEM."""
    def body(i, carry):
        tok = ids_ref[i]                       # scalar SMEM read (dynamic idx)
        m = lut_ref[tok]                       # LUT lookup on the scalar path
        mapped_ref[i] = jnp.minimum(jnp.maximum(m, 0), EMB - 1)
        return carry
    lax.fori_loop(0, BS, body, 0, unroll=True)


def gather_kernel(ids_ref, emb_row_ref, out_ref):
    """Stage 2: one gathered embedding row per grid step.

    ids_ref (scalar-prefetch SMEM ref) is consumed only by the index_maps;
    the body is a pure (1, D) VMEM row copy.
    """
    del ids_ref
    out_ref[...] = emb_row_ref[...]


def token_mapping_forward(input_ids, lut, emb):
    """input_ids: [B,S] int32; lut: [VOCAB] int32 (combined_map, default 0);
    emb: [EMB, D] f32 (pruned tok_embeddings).
    Returns (mapped_ids [B,S] int32, token_embeddings [B,S,D] f32)."""
    ids_flat = input_ids.reshape(BS).astype(jnp.int32)   # reshape is free in XLA

    # ---- stage 1: remap + clamp, scalar path only ----
    mapped_flat = pl.pallas_call(
        remap_kernel,
        out_shape=jax.ShapeDtypeStruct((BS,), jnp.int32),
        in_specs=[
            pl.BlockSpec(memory_space=pltpu.MemorySpace.SMEM),   # ids
            pl.BlockSpec(memory_space=pltpu.MemorySpace.SMEM),   # LUT
        ],
        out_specs=pl.BlockSpec(memory_space=pltpu.MemorySpace.SMEM),
    )(ids_flat, lut)

    # ---- stage 2: data-dependent row gather from the embedding table ----
    emb_rows = pl.pallas_call(
        gather_kernel,
        out_shape=jax.ShapeDtypeStruct((BS, D), emb.dtype),
        grid_spec=pltpu.PrefetchScalarGridSpec(
            num_scalar_prefetch=1,              # mapped ids land in SMEM
            grid=(BS,),                         # one token row per grid step
            in_specs=[
                # block index == row index (block size 1 along rows), so the
                # prefetched mapped id selects the embedding row directly.
                pl.BlockSpec((1, D), lambda i, ids: (ids[i], 0)),
            ],
            out_specs=pl.BlockSpec((1, D), lambda i, ids: (i, 0)),
        ),
        compiler_params=pltpu.CompilerParams(
            dimension_semantics=("arbitrary",)),
        cost_estimate=pl.CostEstimate(
            flops=0, transcendentals=0,
            bytes_accessed=int(2 * BS * D * 4 + BS * 4)),
    )(mapped_flat, emb)

    return mapped_flat.reshape(B, S), emb_rows.reshape(B, S, D)


if __name__ == "__main__":
    key = jax.random.PRNGKey(0)
    input_ids = jax.random.randint(key, (B, S), 0, VOCAB, dtype=jnp.int32)

    # Deterministic synthetic token_map / oov_lookup (shapes per __init__):
    token_map = {v: v % EMB for v in range(0, VOCAB, 3)}
    oov_lookup = {v: EMB + 5 for v in range(1, VOCAB, 7)}   # >EMB -> exercises clamp
    combined_map = dict(token_map)
    combined_map.update(oov_lookup)

    lut_host = np.zeros((VOCAB,), dtype=np.int32)           # default 0 for unmapped ids
    for k, v in combined_map.items():
        lut_host[k] = v
    lut = jnp.asarray(lut_host)

    emb = jax.random.normal(jax.random.PRNGKey(1), (EMB, D), dtype=jnp.float32)

    mapped_ids, token_embs = token_mapping_forward(input_ids, lut, emb)
    jax.block_until_ready((mapped_ids, token_embs))

    # ---- reference (mirrors the PyTorch double loop) ----
    ids_np = np.asarray(input_ids)
    ref_mapped = np.zeros_like(ids_np)
    for i in range(B):
        for j in range(S):
            ref_mapped[i, j] = combined_map.get(int(ids_np[i, j]), 0)
    ref_mapped = np.clip(ref_mapped, 0, EMB - 1)
    ref_embs = np.asarray(emb)[ref_mapped]

    assert np.array_equal(np.asarray(mapped_ids), ref_mapped), "mapped ids mismatch"
    assert np.allclose(np.asarray(token_embs), ref_embs, atol=1e-6), "embeddings mismatch"
    print("KERNEL_OK")
</pallas_src>

<mosaic_0001>
module attributes {stable_mosaic.version = 11 : i64} {
  func.func @remap_kernel(%arg0: memref<16xi32, #tpu.memory_space<smem>>, %arg1: memref<256xi32, #tpu.memory_space<smem>>, %arg2: memref<16xi32, #tpu.memory_space<smem>>) attributes {dimension_semantics = [], scalar_prefetch = 0 : i64, scratch_operands = 0 : i64, tpu.core_type = #tpu.core_type<tc>} {
    %c0_i32 = arith.constant 0 : i32
    %0 = arith.index_cast %c0_i32 : i32 to index
    %1 = memref.load %arg0[%0] : memref<16xi32, #tpu.memory_space<smem>>
    %2 = arith.index_cast %1 : i32 to index
    %3 = memref.load %arg1[%2] : memref<256xi32, #tpu.memory_space<smem>>
    %c0_i32_0 = arith.constant 0 : i32
    %4 = arith.maxsi %3, %c0_i32_0 : i32
    %c63_i32 = arith.constant 63 : i32
    %5 = arith.minsi %4, %c63_i32 : i32
    %6 = arith.index_cast %c0_i32 : i32 to index
    %7 = memref.load %arg2[%6] : memref<16xi32, #tpu.memory_space<smem>>
    memref.store %5, %arg2[%6] : memref<16xi32, #tpu.memory_space<smem>>
    %c1_i32 = arith.constant 1 : i32
    %8 = arith.index_cast %c1_i32 : i32 to index
    %9 = memref.load %arg0[%8] : memref<16xi32, #tpu.memory_space<smem>>
    %10 = arith.index_cast %9 : i32 to index
    %11 = memref.load %arg1[%10] : memref<256xi32, #tpu.memory_space<smem>>
    %c0_i32_1 = arith.constant 0 : i32
    %12 = arith.maxsi %11, %c0_i32_1 : i32
    %c63_i32_2 = arith.constant 63 : i32
    %13 = arith.minsi %12, %c63_i32_2 : i32
    %14 = arith.index_cast %c1_i32 : i32 to index
    %15 = memref.load %arg2[%14] : memref<16xi32, #tpu.memory_space<smem>>
    memref.store %13, %arg2[%14] : memref<16xi32, #tpu.memory_space<smem>>
    %c2_i32 = arith.constant 2 : i32
    %16 = arith.index_cast %c2_i32 : i32 to index
    %17 = memref.load %arg0[%16] : memref<16xi32, #tpu.memory_space<smem>>
    %18 = arith.index_cast %17 : i32 to index
    %19 = memref.load %arg1[%18] : memref<256xi32, #tpu.memory_space<smem>>
    %c0_i32_3 = arith.constant 0 : i32
    %20 = arith.maxsi %19, %c0_i32_3 : i32
    %c63_i32_4 = arith.constant 63 : i32
    %21 = arith.minsi %20, %c63_i32_4 : i32
    %22 = arith.index_cast %c2_i32 : i32 to index
    %23 = memref.load %arg2[%22] : memref<16xi32, #tpu.memory_space<smem>>
    memref.store %21, %arg2[%22] : memref<16xi32, #tpu.memory_space<smem>>
    %c3_i32 = arith.constant 3 : i32
    %24 = arith.index_cast %c3_i32 : i32 to index
    %25 = memref.load %arg0[%24] : memref<16xi32, #tpu.memory_space<smem>>
    %26 = arith.index_cast %25 : i32 to index
    %27 = memref.load %arg1[%26] : memref<256xi32, #tpu.memory_space<smem>>
    %c0_i32_5 = arith.constant 0 : i32
    %28 = arith.maxsi %27, %c0_i32_5 : i32
    %c63_i32_6 = arith.constant 63 : i32
    %29 = arith.minsi %28, %c63_i32_6 : i32
    %30 = arith.index_cast %c3_i32 : i32 to index
    %31 = memref.load %arg2[%30] : memref<16xi32, #tpu.memory_space<smem>>
    memref.store %29, %arg2[%30] : memref<16xi32, #tpu.memory_space<smem>>
    %c4_i32 = arith.constant 4 : i32
    %32 = arith.index_cast %c4_i32 : i32 to index
    %33 = memref.load %arg0[%32] : memref<16xi32, #tpu.memory_space<smem>>
    %34 = arith.index_cast %33 : i32 to index
    %35 = memref.load %arg1[%34] : memref<256xi32, #tpu.memory_space<smem>>
    %c0_i32_7 = arith.constant 0 : i32
    %36 = arith.maxsi %35, %c0_i32_7 : i32
    %c63_i32_8 = arith.constant 63 : i32
    %37 = arith.minsi %36, %c63_i32_8 : i32
    %38 = arith.index_cast %c4_i32 : i32 to index
    %39 = memref.load %arg2[%38] : memref<16xi32, #tpu.memory_space<smem>>
    memref.store %37, %arg2[%38] : memref<16xi32, #tpu.memory_space<smem>>
    %c5_i32 = arith.constant 5 : i32
    %40 = arith.index_cast %c5_i32 : i32 to index
    %41 = memref.load %arg0[%40] : memref<16xi32, #tpu.memory_space<smem>>
    %42 = arith.index_cast %41 : i32 to index
    %43 = memref.load %arg1[%42] : memref<256xi32, #tpu.memory_space<smem>>
    %c0_i32_9 = arith.constant 0 : i32
    %44 = arith.maxsi %43, %c0_i32_9 : i32
    %c63_i32_10 = arith.constant 63 : i32
    %45 = arith.minsi %44, %c63_i32_10 : i32
    %46 = arith.index_cast %c5_i32 : i32 to index
    %47 = memref.load %arg2[%46] : memref<16xi32, #tpu.memory_space<smem>>
    memref.store %45, %arg2[%46] : memref<16xi32, #tpu.memory_space<smem>>
    %c6_i32 = arith.constant 6 : i32
    %48 = arith.index_cast %c6_i32 : i32 to index
    %49 = memref.load %arg0[%48] : memref<16xi32, #tpu.memory_space<smem>>
    %50 = arith.index_cast %49 : i32 to index
    %51 = memref.load %arg1[%50] : memref<256xi32, #tpu.memory_space<smem>>
    %c0_i32_11 = arith.constant 0 : i32
    %52 = arith.maxsi %51, %c0_i32_11 : i32
    %c63_i32_12 = arith.constant 63 : i32
    %53 = arith.minsi %52, %c63_i32_12 : i32
    %54 = arith.index_cast %c6_i32 : i32 to index
    %55 = memref.load %arg2[%54] : memref<16xi32, #tpu.memory_space<smem>>
    memref.store %53, %arg2[%54] : memref<16xi32, #tpu.memory_space<smem>>
    %c7_i32 = arith.constant 7 : i32
    %56 = arith.index_cast %c7_i32 : i32 to index
    %57 = memref.load %arg0[%56] : memref<16xi32, #tpu.memory_space<smem>>
    %58 = arith.index_cast %57 : i32 to index
    %59 = memref.load %arg1[%58] : memref<256xi32, #tpu.memory_space<smem>>
    %c0_i32_13 = arith.constant 0 : i32
    %60 = arith.maxsi %59, %c0_i32_13 : i32
    %c63_i32_14 = arith.constant 63 : i32
    %61 = arith.minsi %60, %c63_i32_14 : i32
    %62 = arith.index_cast %c7_i32 : i32 to index
    %63 = memref.load %arg2[%62] : memref<16xi32, #tpu.memory_space<smem>>
    memref.store %61, %arg2[%62] : memref<16xi32, #tpu.memory_space<smem>>
    %c8_i32 = arith.constant 8 : i32
    %64 = arith.index_cast %c8_i32 : i32 to index
    %65 = memref.load %arg0[%64] : memref<16xi32, #tpu.memory_space<smem>>
    %66 = arith.index_cast %65 : i32 to index
    %67 = memref.load %arg1[%66] : memref<256xi32, #tpu.memory_space<smem>>
    %c0_i32_15 = arith.constant 0 : i32
    %68 = arith.maxsi %67, %c0_i32_15 : i32
    %c63_i32_16 = arith.constant 63 : i32
    %69 = arith.minsi %68, %c63_i32_16 : i32
    %70 = arith.index_cast %c8_i32 : i32 to index
    %71 = memref.load %arg2[%70] : memref<16xi32, #tpu.memory_space<smem>>
    memref.store %69, %arg2[%70] : memref<16xi32, #tpu.memory_space<smem>>
    %c9_i32 = arith.constant 9 : i32
    %72 = arith.index_cast %c9_i32 : i32 to index
    %73 = memref.load %arg0[%72] : memref<16xi32, #tpu.memory_space<smem>>
    %74 = arith.index_cast %73 : i32 to index
    %75 = memref.load %arg1[%74] : memref<256xi32, #tpu.memory_space<smem>>
    %c0_i32_17 = arith.constant 0 : i32
    %76 = arith.maxsi %75, %c0_i32_17 : i32
    %c63_i32_18 = arith.constant 63 : i32
    %77 = arith.minsi %76, %c63_i32_18 : i32
    %78 = arith.index_cast %c9_i32 : i32 to index
    %79 = memref.load %arg2[%78] : memref<16xi32, #tpu.memory_space<smem>>
    memref.store %77, %arg2[%78] : memref<16xi32, #tpu.memory_space<smem>>
    %c10_i32 = arith.constant 10 : i32
    %80 = arith.index_cast %c10_i32 : i32 to index
    %81 = memref.load %arg0[%80] : memref<16xi32, #tpu.memory_space<smem>>
    %82 = arith.index_cast %81 : i32 to index
    %83 = memref.load %arg1[%82] : memref<256xi32, #tpu.memory_space<smem>>
    %c0_i32_19 = arith.constant 0 : i32
    %84 = arith.maxsi %83, %c0_i32_19 : i32
    %c63_i32_20 = arith.constant 63 : i32
    %85 = arith.minsi %84, %c63_i32_20 : i32
    %86 = arith.index_cast %c10_i32 : i32 to index
    %87 = memref.load %arg2[%86] : memref<16xi32, #tpu.memory_space<smem>>
    memref.store %85, %arg2[%86] : memref<16xi32, #tpu.memory_space<smem>>
    %c11_i32 = arith.constant 11 : i32
    %88 = arith.index_cast %c11_i32 : i32 to index
    %89 = memref.load %arg0[%88] : memref<16xi32, #tpu.memory_space<smem>>
    %90 = arith.index_cast %89 : i32 to index
    %91 = memref.load %arg1[%90] : memref<256xi32, #tpu.memory_space<smem>>
    %c0_i32_21 = arith.constant 0 : i32
    %92 = arith.maxsi %91, %c0_i32_21 : i32
    %c63_i32_22 = arith.constant 63 : i32
    %93 = arith.minsi %92, %c63_i32_22 : i32
    %94 = arith.index_cast %c11_i32 : i32 to index
    %95 = memref.load %arg2[%94] : memref<16xi32, #tpu.memory_space<smem>>
    memref.store %93, %arg2[%94] : memref<16xi32, #tpu.memory_space<smem>>
    %c12_i32 = arith.constant 12 : i32
    %96 = arith.index_cast %c12_i32 : i32 to index
    %97 = memref.load %arg0[%96] : memref<16xi32, #tpu.memory_space<smem>>
    %98 = arith.index_cast %97 : i32 to index
    %99 = memref.load %arg1[%98] : memref<256xi32, #tpu.memory_space<smem>>
    %c0_i32_23 = arith.constant 0 : i32
    %100 = arith.maxsi %99, %c0_i32_23 : i32
    %c63_i32_24 = arith.constant 63 : i32
    %101 = arith.minsi %100, %c63_i32_24 : i32
    %102 = arith.index_cast %c12_i32 : i32 to index
    %103 = memref.load %arg2[%102] : memref<16xi32, #tpu.memory_space<smem>>
    memref.store %101, %arg2[%102] : memref<16xi32, #tpu.memory_space<smem>>
    %c13_i32 = arith.constant 13 : i32
    %104 = arith.index_cast %c13_i32 : i32 to index
    %105 = memref.load %arg0[%104] : memref<16xi32, #tpu.memory_space<smem>>
    %106 = arith.index_cast %105 : i32 to index
    %107 = memref.load %arg1[%106] : memref<256xi32, #tpu.memory_space<smem>>
    %c0_i32_25 = arith.constant 0 : i32
    %108 = arith.maxsi %107, %c0_i32_25 : i32
    %c63_i32_26 = arith.constant 63 : i32
    %109 = arith.minsi %108, %c63_i32_26 : i32
    %110 = arith.index_cast %c13_i32 : i32 to index
    %111 = memref.load %arg2[%110] : memref<16xi32, #tpu.memory_space<smem>>
    memref.store %109, %arg2[%110] : memref<16xi32, #tpu.memory_space<smem>>
    %c14_i32 = arith.constant 14 : i32
    %112 = arith.index_cast %c14_i32 : i32 to index
    %113 = memref.load %arg0[%112] : memref<16xi32, #tpu.memory_space<smem>>
    %114 = arith.index_cast %113 : i32 to index
    %115 = memref.load %arg1[%114] : memref<256xi32, #tpu.memory_space<smem>>
    %c0_i32_27 = arith.constant 0 : i32
    %116 = arith.maxsi %115, %c0_i32_27 : i32
    %c63_i32_28 = arith.constant 63 : i32
    %117 = arith.minsi %116, %c63_i32_28 : i32
    %118 = arith.index_cast %c14_i32 : i32 to index
    %119 = memref.load %arg2[%118] : memref<16xi32, #tpu.memory_space<smem>>
    memref.store %117, %arg2[%118] : memref<16xi32, #tpu.memory_space<smem>>
    %c15_i32 = arith.constant 15 : i32
    %120 = arith.index_cast %c15_i32 : i32 to index
    %121 = memref.load %arg0[%120] : memref<16xi32, #tpu.memory_space<smem>>
    %122 = arith.index_cast %121 : i32 to index
    %123 = memref.load %arg1[%122] : memref<256xi32, #tpu.memory_space<smem>>
    %c0_i32_29 = arith.constant 0 : i32
    %124 = arith.maxsi %123, %c0_i32_29 : i32
    %c63_i32_30 = arith.constant 63 : i32
    %125 = arith.minsi %124, %c63_i32_30 : i32
    %126 = arith.index_cast %c15_i32 : i32 to index
    %127 = memref.load %arg2[%126] : memref<16xi32, #tpu.memory_space<smem>>
    memref.store %125, %arg2[%126] : memref<16xi32, #tpu.memory_space<smem>>
    %c16_i32 = arith.constant 16 : i32
    return
  }
}

</mosaic_0001>

<bundles_post_ra>
// kernel: tpu_custom_call.1
= control target key start
LH: loop header
LB: loop body
LE: loop exit
PB: predicated region body
PF: predicated region fallthrough
CT: control target
= control target key end

     0   :  { %7 = vsyncpa [#allocation3], 0  ;;  %s431_s0 = inlined_call_operand.hbm [shape: s32[16], index: 0, kind: input, shape index: {}]   ;;  %s432_s1 = inlined_call_operand.vmem [shape: s32[256], index: 1, kind: input, shape index: {}]   ;;  %s433_s2 = inlined_call_operand.hbm [shape: s32[16], index: 2, kind: output, shape index: {}]  }
   0x1   :  { %8 = vsyncpa [#allocation5], 0 }
   0x2   :  { %9 = vsyncpa [#allocation4], 0  ;;  %s24_s11 = sshll.u32 %s432_s1, 4  ;;  %s308_s14 = scalar_lea.hbm %s431_s0, 16  ;;  %s25_s11 = int_to_ptr.vmem [resolvable:$true] %s24_s11 }
   0x3   :  { %p309_p0 = scmp.ne.s32.totalorder %s431_s0, %s308_s14  ;;  %p312_p1 = scmp.lt.u32.totalorder %s308_s14, %s431_s0 }
   0x5   :  { %p314_p2 = pnand %p312_p1, %p309_p0 }
   0x7   :  { %317 = shalt.err (!%p314_p2)
}
   0x8   :  { %s346_s19 = smov [#allocation2]   ;;  %s318_s1 = scalar_lea.vmem %s25_s11, 32 }
   0x9   :  { %17 = dma.hbm_to_smem %s431_s0, 16, %s346_s19, [#allocation3]  }
   0xa   :  { %p319_p3 = scmp.ne.s32.totalorder %s25_s11, %s318_s1  ;;  %p323_p4 = scmp.lt.s32.totalorder %s25_s11, %s25_s11 }
   0xb   :  { %p324_p5 = scmp.lt.s32.totalorder %s318_s1, %s318_s1 }
   0xd   :  { %p325_p6 = por %p324_p5, %p323_p4 }
   0xf   :  { %p326_p7 = pnand %p325_p6, %p319_p3 }
  0x11   :  { %329 = shalt.err (!%p326_p7)
}
  0x12   :  { %s347_s22 = smov [#allocation6]  }
  0x13   :  { %27 = dma.vmem_to_smem %s25_s11, 32, %s347_s22, [#allocation5]  }
  0x14   :  { %340 = dma.done.wait [#allocation3], 16  }
  0x15   :  { %341 = vsyncadd [#allocation3], 4294967280 }
  0x16   :  { %342 = dma.done.wait [#allocation5], 32  }
  0x17   :  { %343 = vsyncadd [#allocation5], 4294967264 }
  0x18   :  { %34 = sfence }
  0x19   :  { %s35_s23 = sld [smem:[#allocation2]]  ;;  %s183_s24 = sld [smem:[#allocation2 + $0x1]] }
  0x1a   :  { %s189_s25 = sld [smem:[#allocation2 + $0x2]]  ;;  %s195_s26 = sld [smem:[#allocation2 + $0x3]] }
  0x1b   :  { %s201_s0 = sld [smem:[#allocation2 + $0x4]]  ;;  %s207_s27 = sld [smem:[#allocation2 + $0x5]] }
  0x1c   :  { %s213_s28 = sld [smem:[#allocation2 + $0x6]]  ;;  %s219_s29 = sld [smem:[#allocation2 + $0x7]] }
  0x1d   :  { %s225_s30 = sld [smem:[#allocation2 + $0x8]]  ;;  %s231_s3 = sld [smem:[#allocation2 + $0x9]] }
  0x1e   :  { %s237_s4 = sld [smem:[#allocation2 + $0xa]]  ;;  %s243_s5 = sld [smem:[#allocation2 + $0xb]] }
  0x1f   :  { %s36_s6 = sld [smem:[#allocation6 + %s35_s23]] }
  0x20   :  { %s44_s7 = sld [smem:[#allocation6 + %s183_s24]] }
  0x21   :  { %s52_s8 = sld [smem:[#allocation6 + %s189_s25]] }
  0x22   :  { %s60_s9 = sld [smem:[#allocation6 + %s195_s26]] }
  0x23   :  { %s379_s10 = sld [smem:[#allocation6 + %s201_s0]] }
  0x24   :  { %s381_s11 = sld [smem:[#allocation6 + %s207_s27]] }
  0x25   :  { %s383_s12 = sld [smem:[#allocation6 + %s213_s28]]  ;;  %p37_p8 = scmp.gt.s32.totalorder %s36_s6, 0 }
  0x26   :  { %s385_s13 = sld [smem:[#allocation6 + %s219_s29]]  ;;  %p178_p9 = scmp.lt.s32.totalorder %s36_s6, 63 }
  0x27   :  { %s387_s14 = sld [smem:[#allocation6 + %s225_s30]]  ;;  %p45_p10 = scmp.gt.s32.totalorder %s44_s7, 0 }
  0x28   :  { %s389_s15 = sld [smem:[#allocation6 + %s231_s3]]  ;;  %p184_p11 = scmp.lt.s32.totalorder %s44_s7, 63 }
  0x29   :  { %s391_s16 = sld [smem:[#allocation6 + %s237_s4]]  ;;  %s435_s6 = smov (!%p37_p8, %s36_s6), 0 }
  0x2a   :  { %s393_s17 = sld [smem:[#allocation6 + %s243_s5]]  ;;  %s437_s7 = smov (!%p45_p10, %s44_s7), 0 }
  0x2b   :  { %s439_s6 = smov (!%p178_p9, %s435_s6), 63  ;;  %s441_s7 = smov (!%p184_p11, %s437_s7), 63 }
  0x2c   :  { %42 = sst [smem:[#allocation7]] %s439_s6  ;;  %p53_p12 = scmp.gt.s32.totalorder %s52_s8, 0 }
  0x2d   :  { %50 = sst [smem:[#allocation7 + $0x1]] %s441_s7  ;;  %p190_p13 = scmp.lt.s32.totalorder %s52_s8, 63 }
  0x2e   :  { %s443_s8 = smov (!%p53_p12, %s52_s8), 0  ;;  %p61_p0 = scmp.gt.s32.totalorder %s60_s9, 0 }
  0x2f   :  { %p196_p1 = scmp.lt.s32.totalorder %s60_s9, 63  ;;  %s445_s8 = smov (!%p190_p13, %s443_s8), 63 }
  0x30   :  { %s447_s9 = smov (!%p61_p0, %s60_s9), 0  ;;  %58 = sst [smem:[#allocation7 + $0x2]] %s445_s8 }
  0x31   :  { %p69_p2 = scmp.gt.s32.totalorder %s379_s10, 0  ;;  %s449_s9 = smov (!%p196_p1, %s447_s9), 63 }
  0x32   :  { %66 = sst [smem:[#allocation7 + $0x3]] %s449_s9  ;;  %p202_p3 = scmp.lt.s32.totalorder %s379_s10, 63 }
  0x33   :  { %s70_s18 = scalar_select %p69_p2, %s379_s10, 0 }
  0x34   :  { %p77_p4 = scmp.gt.s32.totalorder %s381_s11, 0  ;;  %p208_p5 = scmp.lt.s32.totalorder %s381_s11, 63 }
  0x35   :  { %s451_s18 = smov (!%p202_p3, %s70_s18), 63  ;;  %p85_p6 = scmp.gt.s32.totalorder %s383_s12, 0 }
  0x36   :  { %s453_s11 = smov (!%p77_p4, %s381_s11), 0  ;;  %74 = sst [smem:[#allocation7 + $0x4]] %s451_s18 }
  0x37   :  { %s455_s11 = smov (!%p208_p5, %s453_s11), 63  ;;  %p214_p7 = scmp.lt.s32.totalorder %s383_s12, 63 }
  0x38   :  { %s86_s19 = scalar_select %p85_p6, %s383_s12, 0 }
  0x39   :  { %82 = sst [smem:[#allocation7 + $0x5]] %s455_s11  ;;  %p93_p8 = scmp.gt.s32.totalorder %s385_s13, 0 }
  0x3a   :  { %p220_p9 = scmp.lt.s32.totalorder %s385_s13, 63  ;;  %s457_s19 = smov (!%p214_p7, %s86_s19), 63 }
  0x3b   :  { %s459_s13 = smov (!%p93_p8, %s385_s13), 0  ;;  %90 = sst [smem:[#allocation7 + $0x6]] %s457_s19 }
  0x3c   :  { %p101_p10 = scmp.gt.s32.totalorder %s387_s14, 0  ;;  %s461_s13 = smov (!%p220_p9, %s459_s13), 63 }
  0x3d   :  { %98 = sst [smem:[#allocation7 + $0x7]] %s461_s13  ;;  %p226_p11 = scmp.lt.s32.totalorder %s387_s14, 63 }
  0x3e   :  { %s102_s20 = scalar_select %p101_p10, %s387_s14, 0 }
  0x3f   :  { %p109_p12 = scmp.gt.s32.totalorder %s389_s15, 0  ;;  %p232_p13 = scmp.lt.s32.totalorder %s389_s15, 63 }
  0x40   :  { %s463_s20 = smov (!%p226_p11, %s102_s20), 63  ;;  %p117_p0 = scmp.gt.s32.totalorder %s391_s16, 0 }
  0x41   :  { %s465_s15 = smov (!%p109_p12, %s389_s15), 0  ;;  %106 = sst [smem:[#allocation7 + $0x8]] %s463_s20 }
  0x42   :  { %s467_s15 = smov (!%p232_p13, %s465_s15), 63  ;;  %p238_p1 = scmp.lt.s32.totalorder %s391_s16, 63 }
  0x43   :  { %s118_s21 = scalar_select %p117_p0, %s391_s16, 0 }
  0x44   :  { %114 = sst [smem:[#allocation7 + $0x9]] %s467_s15  ;;  %p125_p2 = scmp.gt.s32.totalorder %s393_s17, 0 }
  0x45   :  { %p244_p3 = scmp.lt.s32.totalorder %s393_s17, 63  ;;  %s469_s21 = smov (!%p238_p1, %s118_s21), 63 }
  0x46   :  { %s471_s17 = smov (!%p125_p2, %s393_s17), 0  ;;  %122 = sst [smem:[#allocation7 + $0xa]] %s469_s21 }
  0x47   :  { %s249_s1 = sld [smem:[#allocation2 + $0xc]]  ;;  %s473_s17 = smov (!%p244_p3, %s471_s17), 63 }
  0x48   :  { %s255_s22 = sld [smem:[#allocation2 + $0xd]]  ;;  %s261_s23 = sld [smem:[#allocation2 + $0xe]] }
  0x49   :  { %130 = sst [smem:[#allocation7 + $0xb]] %s473_s17  ;;  %s267_s24 = sld [smem:[#allocation2 + $0xf]] }
  0x4a   :  { %s330_s3 = scalar_lea.hbm %s433_s2, 16 }
  0x4b   :  { %p331_p12 = scmp.ne.s32.totalorder %s433_s2, %s330_s3  ;;  %p334_p13 = scmp.lt.u32.totalorder %s330_s3, %s433_s2 }
  0x4d   :  { %s132_s25 = sld [smem:[#allocation6 + %s249_s1]]  ;;  %p336_p0 = pnand %p334_p13, %p331_p12 }
  0x4e   :  { %s140_s26 = sld [smem:[#allocation6 + %s255_s22]] }
  0x4f   :  { %s148_s0 = sld [smem:[#allocation6 + %s261_s23]] }
  0x50   :  { %s156_s27 = sld [smem:[#allocation6 + %s267_s24]] }
  0x53   :  { %p133_p4 = scmp.gt.s32.totalorder %s132_s25, 0  ;;  %p250_p5 = scmp.lt.s32.totalorder %s132_s25, 63 }
  0x54   :  { %p141_p6 = scmp.gt.s32.totalorder %s140_s26, 0  ;;  %p256_p7 = scmp.lt.s32.totalorder %s140_s26, 63 }
  0x55   :  { %s475_s25 = smov (!%p133_p4, %s132_s25), 0  ;;  %p149_p8 = scmp.gt.s32.totalorder %s148_s0, 0 }
  0x56   :  { %s477_s25 = smov (!%p250_p5, %s475_s25), 63  ;;  %s479_s26 = smov (!%p141_p6, %s140_s26), 0 }
  0x57   :  { %138 = sst [smem:[#allocation7 + $0xc]] %s477_s25  ;;  %s481_s26 = smov (!%p256_p7, %s479_s26), 63 }
  0x58   :  { %s150_s28 = scalar_select %p149_p8, %s148_s0, 0 }
  0x59   :  { %146 = sst [smem:[#allocation7 + $0xd]] %s481_s26  ;;  %p262_p9 = scmp.lt.s32.totalorder %s148_s0, 63 }
  0x5a   :  { %p157_p10 = scmp.gt.s32.totalorder %s156_s27, 0  ;;  %p268_p11 = scmp.lt.s32.totalorder %s156_s27, 63 }
  0x5b   :  { %s483_s28 = smov (!%p262_p9, %s150_s28), 63 }
  0x5c   :  { %s485_s27 = smov (!%p157_p10, %s156_s27), 0  ;;  %154 = sst [smem:[#allocation7 + $0xe]] %s483_s28 }
  0x5d   :  { %s487_s27 = smov (!%p268_p11, %s485_s27), 63 }
  0x5e   :  { %162 = sst [smem:[#allocation7 + $0xf]] %s487_s27 }
  0x5f   :  { %339 = shalt.err (!%p336_p0)
}
  0x60   :  { %s348_s8 = smov [#allocation7]  }
  0x61   :  { %170 = dma.smem_to_hbm %s348_s8, 16, %s433_s2, [#allocation4]  }
  0x62   :  { %344 = dma.done.wait [#allocation4], 16  }
  0x63   :  { %345 = vsyncadd [#allocation4], 4294967280 }
  0x64   :  { %174 = sfence }
  0x65   :  { %175 = vsyncpa [#allocation3], 1 }
  0x66   :  { %176 = vsyncpa [#allocation4], 1 }
  0x67   :  { %177 = vsyncpa [#allocation5], 1 }

</bundles_post_ra>
